<compile_context>
chip_gen: v7x
topology: tpu7x:2x2x1
jax: 0.10.0
libtpu: 0.0.40
codegen_flags: <defaults>
</compile_context>

<pallas_src>
import jax
import jax.numpy as jnp
from jax.experimental import pallas as pl
from jax.experimental.pallas import tpu as pltpu


def _gemv_kernel(x_ref, w_ref, b_ref, o_ref):
    # x_ref: (R, IN)  activations for R batch rows (tail block may be partial;
    #                 out-of-range rows hold garbage and their outputs are
    #                 clipped out of the writeback by Pallas).
    # w_ref: (8, IN)  weight row replicated across 8 sublanes, VMEM-resident.
    # b_ref: (1,)     bias scalar in SMEM.
    # o_ref: (1, R)   lane-dense output row: o[0, r] = y[block_start + r].
    #
    # Contract over IN with batch on the RHS's non-contracted axis (w @ x^T), so
    # the MXU result lands with batch on the lane axis -> dense stores and a
    # contiguous VMEM->HBM writeback.
    acc = jax.lax.dot_general(
        w_ref[...], x_ref[...],
        dimension_numbers=(((1,), (1,)), ((), ())),      # (8,K) x (R,K) -> (8,R)
        preferred_element_type=jnp.float32,
    )
    o_ref[...] = (acc[0:1, :] + b_ref[0]).astype(o_ref.dtype)


def predictor_forward(x, weight, bias, *, block_rows=16384):
    """y = x @ weight.T + bias (PyTorch nn.Linear(IN, 1) forward).

    x:      (B, IN) float32
    weight: (1, IN) float32  (PyTorch layout: (out_features, in_features))
    bias:   (1,)    float32
    returns (B, 1)  float32
    """
    B, IN = x.shape
    OUT = weight.shape[0]
    assert OUT == 1 and weight.shape[1] == IN, "kernel is specialized for Linear(IN, 1)"

    LANE = 128
    # Keep >= 2 grid steps when the batch allows it (v7x has 2 TensorCores and the
    # grid axis is marked "parallel"); cap the block so the per-step x DMA stays
    # ~4 MiB, which amortizes the fixed ~0.35 us per-step overhead.
    r = max(LANE, min(block_rows, pl.cdiv(pl.cdiv(B, 2), LANE) * LANE))
    grid = (pl.cdiv(B, r),)

    x_f = x.astype(jnp.float32)
    w8 = jnp.broadcast_to(weight.astype(jnp.float32).reshape(1, IN), (8, IN))
    b1 = bias.astype(jnp.float32).reshape(1)

    out_row = pl.pallas_call(
        _gemv_kernel,
        out_shape=jax.ShapeDtypeStruct((1, B), jnp.float32),
        grid_spec=pltpu.PrefetchScalarGridSpec(
            num_scalar_prefetch=0,
            grid=grid,
            in_specs=[
                pl.BlockSpec((r, IN), lambda i: (i, 0)),            # streamed x rows
                pl.BlockSpec((8, IN), lambda i: (0, 0)),            # resident weight
                pl.BlockSpec(memory_space=pltpu.MemorySpace.SMEM),  # bias (1,)
            ],
            out_specs=pl.BlockSpec((1, r), lambda i: (0, i)),       # lane-dense y row
        ),
        compiler_params=pltpu.CompilerParams(
            dimension_semantics=("parallel",),       # independent batch blocks
            vmem_limit_bytes=32 * 1024 * 1024,       # lane-padded x bufs > v5e's 16 MiB default
        ),
    )(x_f, w8, b1)

    # (1, B) -> (B, 1) is a free row-major reshape; no padding was added, so no slice.
    return out_row.reshape(B, OUT)


if __name__ == "__main__":
    key = jax.random.PRNGKey(0)
    kx, kw, kb = jax.random.split(key, 3)

    IN, OUT = 64, 1
    bound = 1.0 / (IN ** 0.5)
    weight = jax.random.uniform(kw, (OUT, IN), minval=-bound, maxval=bound,
                                dtype=jnp.float32)
    bias = jax.random.uniform(kb, (OUT,), minval=-bound, maxval=bound,
                              dtype=jnp.float32)

    # Small shape matching the module spec, an odd ragged batch (no pad/copy
    # path), and a multi-block batch that exercises the 2-step grid.
    for B in (8, 777, 1200):
        x = jax.random.normal(jax.random.fold_in(kx, B), (B, IN),
                              dtype=jnp.float32)
        y = jax.block_until_ready(predictor_forward(x, weight, bias))
        y_ref = x @ weight.T + bias
        assert y.shape == (B, OUT)
        err = float(jnp.max(jnp.abs(y - y_ref)))
        assert jnp.allclose(y, y_ref, atol=1e-5, rtol=1e-5), (
            f"mismatch at B={B}: max err {err:.3e}")

    print("KERNEL_OK")
</pallas_src>

<mosaic_0001>
module attributes {stable_mosaic.version = 11 : i64} {
  func.func @_gemv_kernel(%arg0: i32, %arg1: memref<128x64xf32, #tpu.memory_space<vmem>>, %arg2: memref<8x64xf32, #tpu.memory_space<vmem>>, %arg3: memref<1xf32, #tpu.memory_space<smem>>, %arg4: memref<1x128xf32, #tpu.memory_space<vmem>>) attributes {dimension_semantics = [#tpu.dimension_semantics<parallel>], iteration_bounds = array<i64: 1>, scalar_prefetch = 0 : i64, scratch_operands = 0 : i64, tpu.core_type = #tpu.core_type<tc>, window_params = [{transform_indices = @transform_0, window_bounds = array<i64: 128, 64>}, {pipeline_mode = #tpu.pipeline_mode<synchronous>, transform_indices = @transform_1, window_bounds = array<i64: 8, 64>}, {transform_indices = @transform_2, window_bounds = array<i64: 1>}, {transform_indices = @transform_3, window_bounds = array<i64: 1, 128>}]} {
    %c0 = arith.constant 0 : index
    %c0_0 = arith.constant 0 : index
    %0 = vector.load %arg2[%c0, %c0_0] : memref<8x64xf32, #tpu.memory_space<vmem>>, vector<8x64xf32>
    %c0_1 = arith.constant 0 : index
    %c0_2 = arith.constant 0 : index
    %1 = vector.load %arg1[%c0_1, %c0_2] : memref<128x64xf32, #tpu.memory_space<vmem>>, vector<128x64xf32>
    %cst = arith.constant dense<0.000000e+00> : vector<8x128xf32>
    %2 = tpu.matmul %0, %1, %cst {dimension_numbers = #tpu.dot_dimension_numbers<[1], [1], [0], [0], [0, 0, 1, 0], [], []>} : vector<8x64xf32>, vector<128x64xf32>, vector<8x128xf32> -> vector<8x128xf32>
    %3 = vector.extract_strided_slice %2 {offsets = [0, 0], sizes = [1, 128], strides = [1, 1]} : vector<8x128xf32> to vector<1x128xf32>
    %c0_3 = arith.constant 0 : index
    %4 = memref.load %arg3[%c0_3] : memref<1xf32, #tpu.memory_space<smem>>
    %5 = vector.broadcast %4 : f32 to vector<1x128xf32>
    %6 = arith.addf %3, %5 : vector<1x128xf32>
    %c0_4 = arith.constant 0 : index
    %c0_5 = arith.constant 0 : index
    %7 = vector.load %arg4[%c0_4, %c0_5] : memref<1x128xf32, #tpu.memory_space<vmem>>, vector<1x128xf32>
    tpu.vector_store %arg4[%c0_4, %c0_5], %6 {strides = array<i32>} : memref<1x128xf32, #tpu.memory_space<vmem>>, vector<1x128xf32>,
    return
  }
  func.func @transform_0(%arg0: i32) -> (i32, i32) {
    %c0_i32 = arith.constant 0 : i32
    %c0_i32_0 = arith.constant 0 : i32
    return %arg0, %c0_i32 : i32, i32
  }
  func.func @transform_1(%arg0: i32) -> (i32, i32) {
    %c0_i32 = arith.constant 0 : i32
    %c0_i32_0 = arith.constant 0 : i32
    %c0_i32_1 = arith.constant 0 : i32
    return %c0_i32, %c0_i32_0 : i32, i32
  }
  func.func @transform_2(%arg0: i32) -> i32 {
    %c0_i32 = arith.constant 0 : i32
    %c0_i32_0 = arith.constant 0 : i32
    return %c0_i32 : i32
  }
  func.func @transform_3(%arg0: i32) -> (i32, i32) {
    %c0_i32 = arith.constant 0 : i32
    %c0_i32_0 = arith.constant 0 : i32
    return %c0_i32, %arg0 : i32, i32
  }
}

</mosaic_0001>

<bundles_post_ra>
// kernel: tpu_custom_call.1
= control target key start
LH: loop header
LB: loop body
LE: loop exit
PB: predicated region body
PF: predicated region fallthrough
CT: control target
= control target key end

     0   :  { %9 = vsyncpa [#allocation4], 0  ;;  %s472_s0 = inlined_call_operand.hbm [shape: f32[8,64], index: 0, kind: input, shape index: {}]   ;;  %s473_s1 = inlined_call_operand.hbm [shape: f32[8,64], index: 1, kind: input, shape index: {}]   ;;  %s474_s2 = inlined_call_operand.<no memory space> [shape: f32[1], index: 2, kind: input, shape index: {}]   ;;  %s475_s3 = inlined_call_operand.hbm [shape: f32[1,8], index: 3, kind: output, shape index: {}]  }
   0x1   :  { %10 = vsyncpa [#allocation7], 0 }
   0x2   :  { %11 = vsyncpa [#allocation5], 0 }
   0x3   :  { %16 = vsyncadd [#allocation4], 1920  ;;  %s382_s12 = smov [#allocation3]   ;;  %s310_s16 = scalar_lea.hbm %s472_s0, 128 }
   0x4   :  { %s17_s13 = sshll.u32 %s382_s12, 4  ;;  %p311_p0 = scmp.ne.s32.totalorder %s472_s0, %s310_s16  ;;  %s18_s13 = int_to_ptr.vmem [resolvable:$true] %s17_s13 }
   0x5   :  { %p314_p1 = scmp.lt.u32.totalorder %s310_s16, %s472_s0 }
   0x7   :  { %p316_p2 = pnand %p314_p1, %p311_p0 }
   0x9   :  { %319 = shalt.err (!%p316_p2)
}
   0xa   :  { %s320_s21 = scalar_lea.vmem %s18_s13, 128  ;;  %s324_s22 = scalar_lea.vmem %s18_s13, 2048 }
   0xb   :  { %p321_p3 = scmp.ne.s32.totalorder %s18_s13, %s320_s21  ;;  %p325_p4 = scmp.lt.s32.totalorder %s18_s13, %s18_s13 }
   0xc   :  { %p326_p5 = scmp.lt.s32.totalorder %s324_s22, %s320_s21 }
   0xe   :  { %p327_p6 = por %p326_p5, %p325_p4 }
  0x10   :  { %p328_p7 = pnand %p327_p6, %p321_p3 }
  0x12   :  { %331 = shalt.err (!%p328_p7)
}
  0x13   :  { %s383_s23 = smov 128   ;;  %s384_s24 = smov 8  }
  0x14   :  { %23 = dma.hbm_to_vmem [thread:$0]  %s472_s0, 128, %s18_s13, [#allocation4], %s383_s23, %s383_s23, %s384_s24  }
  0x15   :  { %s385_s27 = smov [#allocation6]   ;;  %s332_s4 = scalar_lea.hbm %s473_s1, 128 }
  0x16   :  { %s30_s28 = sshll.u32 %s385_s27, 4  ;;  %p333_p8 = scmp.ne.s32.totalorder %s473_s1, %s332_s4  ;;  %s31_s28 = int_to_ptr.vmem [resolvable:$true] %s30_s28 }
  0x17   :  { %p336_p9 = scmp.lt.u32.totalorder %s332_s4, %s473_s1 }
  0x19   :  { %p338_p10 = pnand %p336_p9, %p333_p8 }
  0x1b   :  { %341 = shalt.err (!%p338_p10)
}
  0x1c   :  { %s342_s9 = scalar_lea.vmem %s31_s28, 128  ;;  %p347_p12 = scmp.lt.s32.totalorder %s31_s28, %s31_s28 }
  0x1d   :  { %p343_p11 = scmp.ne.s32.totalorder %s31_s28, %s342_s9  ;;  %p348_p13 = scmp.lt.s32.totalorder %s342_s9, %s342_s9 }
  0x1f   :  { %p349_p0 = por %p348_p13, %p347_p12 }
  0x21   :  { %p350_p1 = pnand %p349_p0, %p343_p11 }
  0x23   :  { %353 = shalt.err (!%p350_p1)
}
  0x24   :  { %33 = dma.hbm_to_vmem [thread:$0]  %s473_s1, 128, %s31_s28, [#allocation7]  }
  0x25   :  { %376 = dma.done.wait [#allocation4], 2048  }
  0x26   :  { %377 = vsyncadd [#allocation4], 4294965248 }
  0x27   :  { %378 = dma.done.wait [#allocation7], 128  }
  0x28   :  { %379 = vsyncadd [#allocation7], 4294967168  ;;  %v386_v0 = vmov 0.0|0.0   ;;  %vm387_vm0 = vmmov 0   ;;  %v388_v1 = vmov 0.0   ;;  %vm59_vm1 = vcmask 523264  }
  0x29   :  { %270 = vmatprep.subr.bf16.mxu0 %v386_v0  ;;  %267 = vmatprep.mubr.msk.f32.mxu0 %vm387_vm0, %v388_v1  ;;  %v43_v2 = vld [vmem:[#allocation3] sm:$0xff]  ;;  %v44_v3 = vld [vmem:[#allocation3 + $0x8] sm:$0xff]  ;;  %vm436_vm2 = vmpackc.low %vm59_vm1, %vm59_vm1  ;;  %v182_v28 = vstv %s474_s2  ;;  %s389_s12 = smov [#allocation8]  }
  0x2a   :  { %v271_v5 = vpack.c.bf16 %v44_v3, %v43_v2  ;;  %v45_v6 = vld [vmem:[#allocation3 + $0x10] sm:$0xff]  ;;  %v46_v7 = vld [vmem:[#allocation3 + $0x18] sm:$0xff]  ;;  %v47_v9 = vld [vmem:[#allocation3 + $0x20] sm:$0xff]  ;;  %s191_s13 = sshll.u32 %s389_s12, 4  ;;  %s192_s13 = int_to_ptr.vmem [resolvable:$true] %s191_s13 }
  0x2b   :  { %v275_v8 = vpack.c.bf16 %v46_v7, %v45_v6  ;;  %v48_v10 = vld [vmem:[#allocation3 + $0x28] sm:$0xff]  ;;  %v49_v12 = vld [vmem:[#allocation3 + $0x30] sm:$0xff]  ;;  %v50_v13 = vld [vmem:[#allocation3 + $0x38] sm:$0xff]  ;;  %s354_s14 = scalar_lea.vmem %s192_s13, 16  ;;  %s358_s15 = scalar_lea.vmem %s192_s13, 32 }
  0x2c   :  { %273 = vmatpush3.bf16.xpose.msk.msra.mxu0 %vm436_vm2, %v271_v5  ;;  %v279_v11 = vpack.c.bf16 %v48_v10, %v47_v9  ;;  %v283_v14 = vpack.c.bf16 %v50_v13, %v49_v12  ;;  %v51_v15 = vld [vmem:[#allocation3 + $0x40] sm:$0xff]  ;;  %v52_v16 = vld [vmem:[#allocation3 + $0x48] sm:$0xff]  ;;  %v53_v18 = vld [vmem:[#allocation3 + $0x50] sm:$0xff]  ;;  %p355_p2 = scmp.ne.s32.totalorder %s192_s13, %s354_s14  ;;  %p359_p3 = scmp.lt.s32.totalorder %s192_s13, %s192_s13 }
  0x2d   :  { %274 = vmatprep.subr.bf16.mxu0 %v386_v0  ;;  %v287_v17 = vpack.c.bf16 %v52_v16, %v51_v15  ;;  %v54_v19 = vld [vmem:[#allocation3 + $0x58] sm:$0xff]  ;;  %v55_v21 = vld [vmem:[#allocation3 + $0x60] sm:$0xff]  ;;  %v56_v22 = vld [vmem:[#allocation3 + $0x68] sm:$0xff]  ;;  %p360_p4 = scmp.lt.s32.totalorder %s358_s15, %s354_s14 }
  0x2e   :  { %v291_v20 = vpack.c.bf16 %v54_v19, %v53_v18  ;;  %v295_v23 = vpack.c.bf16 %v56_v22, %v55_v21  ;;  %v57_v24 = vld [vmem:[#allocation3 + $0x70] sm:$0xff]  ;;  %v58_v25 = vld [vmem:[#allocation3 + $0x78] sm:$0xff]  ;;  %v42_v27 = vld [vmem:[#allocation6] sm:$0xff] }
  0x2f   :  { %v299_v26 = vpack.c.bf16 %v58_v25, %v57_v24  ;;  %p361_p5 = por %p360_p4, %p359_p3 }
  0x31   :  { %p362_p6 = pnand %p361_p5, %p355_p2 }
  0x34   :  { %277 = vmatpush3.bf16.xpose.msk.msra.mxu0 %vm436_vm2, %v275_v8 }
  0x35   :  { %278 = vmatprep.subr.bf16.mxu0 %v386_v0 }
  0x3c   :  { %281 = vmatpush3.bf16.xpose.msk.msra.mxu0 %vm436_vm2, %v279_v11 }
  0x3d   :  { %282 = vmatprep.subr.bf16.mxu0 %v386_v0 }
  0x44   :  { %285 = vmatpush3.bf16.xpose.msk.msra.mxu0 %vm436_vm2, %v283_v14 }
  0x45   :  { %286 = vmatprep.subr.bf16.mxu0 %v386_v0 }
  0x4c   :  { %289 = vmatpush3.bf16.xpose.msk.msra.mxu0 %vm436_vm2, %v287_v17 }
  0x4d   :  { %290 = vmatprep.subr.bf16.mxu0 %v386_v0 }
  0x54   :  { %293 = vmatpush3.bf16.xpose.msk.msra.mxu0 %vm436_vm2, %v291_v20 }
  0x55   :  { %294 = vmatprep.subr.bf16.mxu0 %v386_v0 }
  0x5c   :  { %297 = vmatpush3.bf16.xpose.msk.msra.mxu0 %vm436_vm2, %v295_v23 }
  0x5d   :  { %298 = vmatprep.subr.bf16.mxu0 %v386_v0 }
  0x64   :  { %301 = vmatpush3.bf16.xpose.msk.msra.mxu0 %vm436_vm2, %v299_v26 }
  0x6b   :  { %268 = vmatmul.mubr.msk.f32.vlgmr.msra.gmra.mrb[0].mxu0 %vm59_vm1, %v42_v27 }
 0x13e   :  { %v177_v29 = vpop.f32.mrb[0].mxu0 }
 0x13f   :  { %v183_v30 = vadd.f32 %v182_v28, %v177_v29  ;;  %v269_v31 = vpop.f32.mrb[1].mxu0 }
 0x141   :  { %184 = vst [vmem:[#allocation8] sm:$0x1] %v183_v30 }
 0x142   :  { %365 = shalt.err (!%p362_p6)
}
 0x143   :  { %s366_s18 = scalar_lea.hbm %s475_s3, 16 }
 0x144   :  { %p367_p7 = scmp.ne.s32.totalorder %s475_s3, %s366_s18  ;;  %p370_p8 = scmp.lt.u32.totalorder %s366_s18, %s475_s3 }
 0x146   :  { %p372_p9 = pnand %p370_p8, %p367_p7 }
 0x148   :  { %375 = shalt.err (!%p372_p9)
}
 0x149   :  { %194 = dma.vmem_to_hbm [thread:$0]  %s192_s13, 16, %s475_s3, [#allocation5]  }
 0x14a   :  { %380 = dma.done.wait [#allocation5], 16  }
 0x14b   :  { %381 = vsyncadd [#allocation5], 4294967280 }
 0x14c   :  { %198 = vsyncpa [#allocation4], 1 }
 0x14d   :  { %199 = vsyncpa [#allocation7], 1 }
 0x14e   :  { %200 = vsyncpa [#allocation5], 1 }

</bundles_post_ra>
